<compile_context>
chip_gen: v7x
topology: tpu7x:2x2x1
jax: 0.10.0
libtpu: 0.0.40
codegen_flags: <defaults>
</compile_context>

<pallas_src>
import functools

import jax
import jax.numpy as jnp
from jax.experimental import pallas as pl
from jax.experimental.pallas import tpu as pltpu


def _dice_sums_kernel(x_ref, t_ref, m_ref, out_ref,
                      prod_acc, s_acc, t_acc, *, hw, tile, tail):
    j = pl.program_id(1)

    @pl.when(j == 0)
    def _():
        prod_acc[...] = jnp.zeros_like(prod_acc)
        s_acc[...] = jnp.zeros_like(s_acc)
        t_acc[...] = jnp.zeros_like(t_acc)

    x = x_ref[...].astype(jnp.float32)      # (C, tile)  — bf16/f32 ok
    t = t_ref[...].astype(jnp.float32)      # (C, tile)  — int8/bool/float ok
    m = m_ref[...].astype(jnp.float32)      # (1, tile)  — broadcasts over C

    # sigmoid(z) == 0.5 * tanh(0.5 * z) + 0.5 : one EUP transcendental.
    # Note: masked pixels give sigmoid(0) = 0.5, matching the PyTorch spec
    # torch.sigmoid(input * mask.unsqueeze(1)).
    s = 0.5 * jnp.tanh(0.5 * (x * m)) + 0.5

    if tail:
        # Only traced when HW % tile != 0: mask out-of-range lanes of the
        # ragged last tile (OOB block contents are undefined, possibly NaN,
        # so use where-selects rather than multiplies).
        lane = jax.lax.broadcasted_iota(jnp.int32, (1, tile), 1)
        valid = (j * tile + lane) < hw
        s = jnp.where(valid, s, 0.0)
        t = jnp.where(valid, t, 0.0)

    prod_acc[...] += jnp.sum(s * t, axis=1, keepdims=True)   # (C, 1)
    s_acc[...] += jnp.sum(s, axis=1, keepdims=True)          # (C, 1)
    t_acc[...] += jnp.sum(t, axis=1, keepdims=True)          # (C, 1)

    @pl.when(j == pl.num_programs(1) - 1)
    def _():
        out_ref[:, 0:1] = prod_acc[...]
        out_ref[:, 1:2] = s_acc[...]
        out_ref[:, 2:3] = t_acc[...]


def _row_vmem_bytes(rows, itemsize):
    # VMEM bytes per lane for a (rows, tile) slab: sublanes pack to a
    # 32-byte granule per lane regardless of dtype (8xf32 / 16xbf16 / 32xi8).
    return ((rows * itemsize + 31) // 32) * 32


def binary_log_dice_loss(x, target, mask, smooth=1.0, max_tile=32768,
                         vmem_budget_bytes=24 << 20):
    """Equivalent of WrappedBinaryLogDice.forward(input, target, mask).

    x:      (B, C, H, W) logits (f32 or bf16)
    target: (B, C, H, W) (float / int8 / bool)
    mask:   (B, H, W)    (float / int8 / bool)
    """
    B, C, H, W = x.shape
    HW = H * W

    # Free reshapes — no transpose, no HBM copy, no padding.
    xr = x.reshape(B, C, HW)
    tr = target.reshape(B, C, HW)
    mr = mask.reshape(B, 1, HW)

    # VMEM accounting per lane: double-buffered input blocks + 3 f32
    # (C, 1) accumulators (negligible, but keep the formula honest).
    bytes_per_lane = 2 * (_row_vmem_bytes(C, xr.dtype.itemsize)
                          + _row_vmem_bytes(C, tr.dtype.itemsize)
                          + _row_vmem_bytes(1, mr.dtype.itemsize))
    max_tile = max(128, (int(max_tile) // 128) * 128)
    cap = max(128, (int(vmem_budget_bytes) // bytes_per_lane) // 128 * 128)
    tile_cap = min(max_tile, cap)

    if HW <= tile_cap:
        tile = HW            # full-dim block: no 128-divisibility required
        grid_j = 1
        tail = False
    else:
        tile = tile_cap      # multiple of 128
        grid_j = pl.cdiv(HW, tile)
        tail = (HW % tile) != 0

    # Explicit scoped-VMEM limit (accounted usage + headroom), capped at the
    # smallest physical VMEM per TensorCore across generations (v7x: 64 MiB).
    accounted = bytes_per_lane * tile + 3 * _row_vmem_bytes(C, 4)
    vmem_limit = int(min(64 << 20, max(32 << 20, accounted + (8 << 20))))

    kernel = functools.partial(_dice_sums_kernel, hw=HW, tile=tile, tail=tail)

    sums = pl.pallas_call(
        kernel,
        out_shape=jax.ShapeDtypeStruct((B, C, 3), jnp.float32),
        grid_spec=pltpu.PrefetchScalarGridSpec(
            num_scalar_prefetch=0,
            grid=(B, grid_j),
            in_specs=[
                pl.BlockSpec((None, C, tile), lambda b, j: (b, 0, j)),
                pl.BlockSpec((None, C, tile), lambda b, j: (b, 0, j)),
                pl.BlockSpec((None, 1, tile), lambda b, j: (b, 0, j)),
            ],
            out_specs=pl.BlockSpec((None, C, 3), lambda b, j: (b, 0, 0)),
            scratch_shapes=[
                pltpu.VMEM((C, 1), jnp.float32),
                pltpu.VMEM((C, 1), jnp.float32),
                pltpu.VMEM((C, 1), jnp.float32),
            ],
        ),
        compiler_params=pltpu.CompilerParams(
            dimension_semantics=("parallel", "arbitrary"),
            vmem_limit_bytes=vmem_limit),
    )(xr, tr, mr)

    # Tiny scalar epilogue in plain JAX.
    inter = jnp.sum(sums[:, :, 0], axis=0)    # (C,)
    s_sum = jnp.sum(sums[:, :, 1], axis=0)    # (C,)
    t_sum = jnp.sum(sums[:, :, 2], axis=0)    # (C,)
    per_cl = -jnp.log((2.0 * inter + smooth) / (s_sum + t_sum + smooth))
    return jnp.sum(per_cl)


def _reference(x, target, mask, smooth=1.0):
    s = jax.nn.sigmoid(x * mask[:, None, :, :])
    C = x.shape[1]
    total = 0.0
    for cl in range(C):
        iflat = s[:, cl].reshape(-1)
        tflat = target[:, cl].reshape(-1)
        inter = jnp.sum(iflat * tflat)
        total = total + (-jnp.log((2.0 * inter + smooth) /
                                  (jnp.sum(iflat) + jnp.sum(tflat) + smooth)))
    return total


if __name__ == "__main__":
    key = jax.random.PRNGKey(0)
    k1, k2, k3 = jax.random.split(key, 3)

    B, C, H, W = 2, 4, 16, 16
    # Demonstrate the low-traffic dtypes: bf16 logits, int8 target/mask.
    x = jax.random.normal(k1, (B, C, H, W), dtype=jnp.float32).astype(jnp.bfloat16)
    target = (jax.random.uniform(k2, (B, C, H, W)) > 0.5).astype(jnp.int8)
    mask = (jax.random.uniform(k3, (B, H, W)) > 0.3).astype(jnp.int8)

    loss = binary_log_dice_loss(x, target, mask, smooth=1.0)
    jax.block_until_ready(loss)

    ref = _reference(x.astype(jnp.float32), target.astype(jnp.float32),
                     mask.astype(jnp.float32), smooth=1.0)
    # Tolerance covers tanh-vs-sigmoid EUP approximation and f32 sum order.
    assert jnp.allclose(loss, ref, rtol=1e-4, atol=1e-4), (loss, ref)

    print("KERNEL_OK")
</pallas_src>

<mosaic_0001>
module attributes {stable_mosaic.version = 11 : i64} {
  func.func @_dice_sums_kernel(%arg0: i32, %arg1: i32, %arg2: memref<1x4x256xbf16, #tpu.memory_space<vmem>>, %arg3: memref<1x4x256xi8, #tpu.memory_space<vmem>>, %arg4: memref<1x1x256xi8, #tpu.memory_space<vmem>>, %arg5: memref<1x4x3xf32, #tpu.memory_space<vmem>>, %arg6: memref<4x1xf32, #tpu.memory_space<vmem>>, %arg7: memref<4x1xf32, #tpu.memory_space<vmem>>, %arg8: memref<4x1xf32, #tpu.memory_space<vmem>>) attributes {dimension_semantics = [#tpu.dimension_semantics<parallel>, #tpu.dimension_semantics<arbitrary>], iteration_bounds = array<i64: 2, 1>, scalar_prefetch = 0 : i64, scratch_operands = 3 : i64, tpu.core_type = #tpu.core_type<tc>, window_params = [{transform_indices = @transform_0, window_bounds = array<i64: 1, 4, 256>}, {transform_indices = @transform_1, window_bounds = array<i64: 1, 4, 256>}, {transform_indices = @transform_2, window_bounds = array<i64: 1, 1, 256>}, {transform_indices = @transform_3, window_bounds = array<i64: 1, 4, 3>}]} {
    %c0_i32 = arith.constant 0 : i32
    %0 = arith.cmpi eq, %arg1, %c0_i32 : i32
    %1 = arith.extui %0 : i1 to i32
    %c0_i32_0 = arith.constant 0 : i32
    %2 = arith.cmpi ne, %1, %c0_i32_0 : i32
    scf.if %2 {
      %cst_28 = arith.constant 0.000000e+00 : f32
      %40 = vector.broadcast %cst_28 : f32 to vector<4x1xf32>
      %c0_29 = arith.constant 0 : index
      %c0_30 = arith.constant 0 : index
      %41 = vector.load %arg6[%c0_29, %c0_30] : memref<4x1xf32, #tpu.memory_space<vmem>>, vector<4x1xf32>
      tpu.vector_store %arg6[%c0_29, %c0_30], %40 {strides = array<i32>} : memref<4x1xf32, #tpu.memory_space<vmem>>, vector<4x1xf32>,
      %cst_31 = arith.constant 0.000000e+00 : f32
      %42 = vector.broadcast %cst_31 : f32 to vector<4x1xf32>
      %c0_32 = arith.constant 0 : index
      %c0_33 = arith.constant 0 : index
      %43 = vector.load %arg7[%c0_32, %c0_33] : memref<4x1xf32, #tpu.memory_space<vmem>>, vector<4x1xf32>
      tpu.vector_store %arg7[%c0_32, %c0_33], %42 {strides = array<i32>} : memref<4x1xf32, #tpu.memory_space<vmem>>, vector<4x1xf32>,
      %cst_34 = arith.constant 0.000000e+00 : f32
      %44 = vector.broadcast %cst_34 : f32 to vector<4x1xf32>
      %c0_35 = arith.constant 0 : index
      %c0_36 = arith.constant 0 : index
      %45 = vector.load %arg8[%c0_35, %c0_36] : memref<4x1xf32, #tpu.memory_space<vmem>>, vector<4x1xf32>
      tpu.vector_store %arg8[%c0_35, %c0_36], %44 {strides = array<i32>} : memref<4x1xf32, #tpu.memory_space<vmem>>, vector<4x1xf32>,
    } else {
    }
    %c0 = arith.constant 0 : index
    %c0_1 = arith.constant 0 : index
    %c0_2 = arith.constant 0 : index
    %3 = vector.load %arg2[%c0, %c0_1, %c0_2] : memref<1x4x256xbf16, #tpu.memory_space<vmem>>, vector<1x4x256xbf16>
    %4 = vector.shape_cast %3 : vector<1x4x256xbf16> to vector<4x256xbf16>
    %5 = arith.extf %4 : vector<4x256xbf16> to vector<4x256xf32>
    %c0_3 = arith.constant 0 : index
    %c0_4 = arith.constant 0 : index
    %c0_5 = arith.constant 0 : index
    %6 = vector.load %arg3[%c0_3, %c0_4, %c0_5] : memref<1x4x256xi8, #tpu.memory_space<vmem>>, vector<1x4x256xi8>
    %7 = vector.shape_cast %6 : vector<1x4x256xi8> to vector<4x256xi8>
    %8 = arith.sitofp %7 : vector<4x256xi8> to vector<4x256xf32>
    %c0_6 = arith.constant 0 : index
    %c0_7 = arith.constant 0 : index
    %c0_8 = arith.constant 0 : index
    %9 = vector.load %arg4[%c0_6, %c0_7, %c0_8] : memref<1x1x256xi8, #tpu.memory_space<vmem>>, vector<1x1x256xi8>
    %10 = vector.shape_cast %9 : vector<1x1x256xi8> to vector<1x256xi8>
    %11 = arith.sitofp %10 : vector<1x256xi8> to vector<1x256xf32>
    %12 = vector.broadcast %11 : vector<1x256xf32> to vector<4x256xf32>
    %13 = arith.mulf %5, %12 : vector<4x256xf32>
    %cst = arith.constant 5.000000e-01 : f32
    %14 = vector.broadcast %cst : f32 to vector<4x256xf32>
    %15 = arith.mulf %14, %13 : vector<4x256xf32>
    %16 = math.tanh %15 : vector<4x256xf32>
    %cst_9 = arith.constant 5.000000e-01 : f32
    %17 = vector.broadcast %cst_9 : f32 to vector<4x256xf32>
    %18 = arith.mulf %17, %16 : vector<4x256xf32>
    %cst_10 = arith.constant 5.000000e-01 : f32
    %19 = vector.broadcast %cst_10 : f32 to vector<4x256xf32>
    %20 = arith.addf %18, %19 : vector<4x256xf32>
    %c0_11 = arith.constant 0 : index
    %c0_12 = arith.constant 0 : index
    %21 = vector.load %arg6[%c0_11, %c0_12] : memref<4x1xf32, #tpu.memory_space<vmem>>, vector<4x1xf32>
    %22 = arith.mulf %20, %8 : vector<4x256xf32>
    %cst_13 = arith.constant dense<0.000000e+00> : vector<4xf32>
    %23 = vector.multi_reduction <add>, %22, %cst_13 [1] : vector<4x256xf32> to vector<4xf32>
    %24 = vector.shape_cast %23 : vector<4xf32> to vector<4x1xf32>
    %25 = arith.addf %21, %24 : vector<4x1xf32>
    %c0_14 = arith.constant 0 : index
    %c0_15 = arith.constant 0 : index
    %26 = vector.load %arg6[%c0_14, %c0_15] : memref<4x1xf32, #tpu.memory_space<vmem>>, vector<4x1xf32>
    tpu.vector_store %arg6[%c0_14, %c0_15], %25 {strides = array<i32>} : memref<4x1xf32, #tpu.memory_space<vmem>>, vector<4x1xf32>,
    %c0_16 = arith.constant 0 : index
    %c0_17 = arith.constant 0 : index
    %27 = vector.load %arg7[%c0_16, %c0_17] : memref<4x1xf32, #tpu.memory_space<vmem>>, vector<4x1xf32>
    %cst_18 = arith.constant dense<0.000000e+00> : vector<4xf32>
    %28 = vector.multi_reduction <add>, %20, %cst_18 [1] : vector<4x256xf32> to vector<4xf32>
    %29 = vector.shape_cast %28 : vector<4xf32> to vector<4x1xf32>
    %30 = arith.addf %27, %29 : vector<4x1xf32>
    %c0_19 = arith.constant 0 : index
    %c0_20 = arith.constant 0 : index
    %31 = vector.load %arg7[%c0_19, %c0_20] : memref<4x1xf32, #tpu.memory_space<vmem>>, vector<4x1xf32>
    tpu.vector_store %arg7[%c0_19, %c0_20], %30 {strides = array<i32>} : memref<4x1xf32, #tpu.memory_space<vmem>>, vector<4x1xf32>,
    %c0_21 = arith.constant 0 : index
    %c0_22 = arith.constant 0 : index
    %32 = vector.load %arg8[%c0_21, %c0_22] : memref<4x1xf32, #tpu.memory_space<vmem>>, vector<4x1xf32>
    %cst_23 = arith.constant dense<0.000000e+00> : vector<4xf32>
    %33 = vector.multi_reduction <add>, %8, %cst_23 [1] : vector<4x256xf32> to vector<4xf32>
    %34 = vector.shape_cast %33 : vector<4xf32> to vector<4x1xf32>
    %35 = arith.addf %32, %34 : vector<4x1xf32>
    %c0_24 = arith.constant 0 : index
    %c0_25 = arith.constant 0 : index
    %36 = vector.load %arg8[%c0_24, %c0_25] : memref<4x1xf32, #tpu.memory_space<vmem>>, vector<4x1xf32>
    tpu.vector_store %arg8[%c0_24, %c0_25], %35 {strides = array<i32>} : memref<4x1xf32, #tpu.memory_space<vmem>>, vector<4x1xf32>,
    %c0_i32_26 = arith.constant 0 : i32
    %37 = arith.cmpi eq, %arg1, %c0_i32_26 : i32
    %38 = arith.extui %37 : i1 to i32
    %c0_i32_27 = arith.constant 0 : i32
    %39 = arith.cmpi ne, %38, %c0_i32_27 : i32
    scf.if %39 {
      %c0_28 = arith.constant 0 : index
      %c0_29 = arith.constant 0 : index
      %40 = vector.load %arg6[%c0_28, %c0_29] : memref<4x1xf32, #tpu.memory_space<vmem>>, vector<4x1xf32>
      %c0_30 = arith.constant 0 : index
      %c0_31 = arith.constant 0 : index
      %c0_32 = arith.constant 0 : index
      %41 = vector.load %arg5[%c0_30, %c0_31, %c0_32] : memref<1x4x3xf32, #tpu.memory_space<vmem>>, vector<1x4x1xf32>
      %42 = vector.shape_cast %41 : vector<1x4x1xf32> to vector<4x1xf32>
      %43 = vector.shape_cast %40 : vector<4x1xf32> to vector<1x4x1xf32>
      tpu.vector_store %arg5[%c0_30, %c0_31, %c0_32], %43 {strides = array<i32>} : memref<1x4x3xf32, #tpu.memory_space<vmem>>, vector<1x4x1xf32>,
      %c0_33 = arith.constant 0 : index
      %c0_34 = arith.constant 0 : index
      %44 = vector.load %arg7[%c0_33, %c0_34] : memref<4x1xf32, #tpu.memory_space<vmem>>, vector<4x1xf32>
      %c0_35 = arith.constant 0 : index
      %c0_36 = arith.constant 0 : index
      %c1 = arith.constant 1 : index
      %45 = vector.load %arg5[%c0_35, %c0_36, %c1] : memref<1x4x3xf32, #tpu.memory_space<vmem>>, vector<1x4x1xf32>
      %46 = vector.shape_cast %45 : vector<1x4x1xf32> to vector<4x1xf32>
      %47 = vector.shape_cast %44 : vector<4x1xf32> to vector<1x4x1xf32>
      tpu.vector_store %arg5[%c0_35, %c0_36, %c1], %47 {strides = array<i32>} : memref<1x4x3xf32, #tpu.memory_space<vmem>>, vector<1x4x1xf32>,
      %c0_37 = arith.constant 0 : index
      %c0_38 = arith.constant 0 : index
      %48 = vector.load %arg8[%c0_37, %c0_38] : memref<4x1xf32, #tpu.memory_space<vmem>>, vector<4x1xf32>
      %c0_39 = arith.constant 0 : index
      %c0_40 = arith.constant 0 : index
      %c2 = arith.constant 2 : index
      %49 = vector.load %arg5[%c0_39, %c0_40, %c2] : memref<1x4x3xf32, #tpu.memory_space<vmem>>, vector<1x4x1xf32>
      %50 = vector.shape_cast %49 : vector<1x4x1xf32> to vector<4x1xf32>
      %51 = vector.shape_cast %48 : vector<4x1xf32> to vector<1x4x1xf32>
      tpu.vector_store %arg5[%c0_39, %c0_40, %c2], %51 {strides = array<i32>} : memref<1x4x3xf32, #tpu.memory_space<vmem>>, vector<1x4x1xf32>,
    } else {
    }
    return
  }
  func.func @transform_0(%arg0: i32, %arg1: i32) -> (i32, i32, i32) {
    %c0_i32 = arith.constant 0 : i32
    %c0_i32_0 = arith.constant 0 : i32
    return %arg0, %c0_i32, %arg1 : i32, i32, i32
  }
  func.func @transform_1(%arg0: i32, %arg1: i32) -> (i32, i32, i32) {
    %c0_i32 = arith.constant 0 : i32
    %c0_i32_0 = arith.constant 0 : i32
    return %arg0, %c0_i32, %arg1 : i32, i32, i32
  }
  func.func @transform_2(%arg0: i32, %arg1: i32) -> (i32, i32, i32) {
    %c0_i32 = arith.constant 0 : i32
    %c0_i32_0 = arith.constant 0 : i32
    return %arg0, %c0_i32, %arg1 : i32, i32, i32
  }
  func.func @transform_3(%arg0: i32, %arg1: i32) -> (i32, i32, i32) {
    %c0_i32 = arith.constant 0 : i32
    %c0_i32_0 = arith.constant 0 : i32
    %c0_i32_1 = arith.constant 0 : i32
    return %arg0, %c0_i32, %c0_i32_0 : i32, i32, i32
  }
}

</mosaic_0001>

<bundles_post_ra>
// kernel: tpu_custom_call.1
= control target key start
LH: loop header
LB: loop body
LE: loop exit
PB: predicated region body
PF: predicated region fallthrough
CT: control target
= control target key end

     0   :  { %8 = vsyncpa [#allocation6], 0  ;;  %s798_s0 = inlined_call_operand.hbm [shape: bf16[2,4,256], index: 0, kind: input, shape index: {}]   ;;  %s799_s1 = inlined_call_operand.vmem [shape: s8[2,4,256], index: 1, kind: input, shape index: {}]   ;;  %s800_s2 = inlined_call_operand.vmem [shape: s8[2,1,256], index: 2, kind: input, shape index: {}]   ;;  %s801_s3 = inlined_call_operand.vmem [shape: f32[2,4,3], index: 3, kind: output, shape index: {}]  }
   0x1   :  { %10 = vsyncpa [#allocation6 + $0x1], 0  ;;  %s656_s12 = smov 0   ;;  %s658_s13 = smov 0  }
   0x2   :  { %s660_s14 = smov 0   ;;  %s662_s15 = smov 0  }
   0x3   :  { %s664_s16 = smov 0   ;;  %s666_s17 = smov 0  }
   0x4 LB: > { %s475_s18 = sadd.s32 4294967295, %s630_s17   ;;  %s28_s19 = sadd.s32 1, %s626_s16  ;;  %s630_s17 = sphi %s666_s17, %s16_s17   ;;  %s626_s16 = sphi %s664_s16, %s811_s16   ;;  %s622_s15 = sphi %s662_s15, %s810_s15   ;;  %s618_s14 = sphi %s660_s14, %s809_s14   ;;  %s614_s13 = sphi %s658_s13, %s808_s13   ;;  %s610_s12 = sphi %s656_s12, %s807_s12  }
   0x5   : > { %p30_p0 = scmp.ge.s32.totalorder %s28_s19, 2  ;;  %s37_s20 = sadd.s32 1, %s618_s14 }
   0x6   : > { %p44_p1 = scmp.ne.s32.totalorder %s618_s14, %s614_s13  ;;  %p45_p2 = scmp.eq.s32.totalorder %s630_s17, 0 }
   0x7   : > { %s813_s19 = smov (%p30_p0, %s28_s19), 0  ;;  %p50_p4 = scmp.ne.s32.totalorder %s614_s13, %s610_s12 }
   0x8   : > { %p692_p3 = por %p45_p2, %p44_p1  ;;  %s32_s22 = ssub.s32 %s626_s16, %s813_s19 }
   0x9   : > { %p51_p5 = scmp.eq.s32.totalorder %s475_s18, 0  ;;  %p35_p6 = scmp.eq.s32.totalorder %s32_s22, 0 }
   0xa   : > { %p496_p8 = scmp.lt.s32.totalorder %s630_s17, 2  ;;  %s156_s25 = sand.u32 1, %s618_s14  }
   0xb   : > { %p699_p7 = por %p51_p5, %p50_p4  ;;  %s489_s26 = sshll.u32 %s626_s16, 6 }
   0xc   : > { %s705_s24 = scalar_select %p35_p6, %s618_s14, %s37_s20  }
   0xd   : > { %s479_s27 = sshll.u32 %s156_s25, 2  ;;  %s712_s30 = scalar_lea.hbm %s798_s0, %s489_s26 }
   0xe   : > { %s160_s4 = scalar_lea.vmem [#allocation5], %s479_s27  ;;  %p716_p9 = pnand %p496_p8, %p692_p3 }
   0xf   : > { %s170_s5 = sshll.u32 %s160_s4, 4  ;;  %s157_s7 = scalar_lea.sflag [#allocation6], %s156_s25  ;;  %s720_s5 = int_to_ptr.vmem [resolvable:$true] %s170_s5 }
  0x10   : > { %s550_s8 = scalar_lea.hbm %s712_s30, 64  ;;  %p552_p13 = pneg %p716_p9 }
  0x11   : > { %p551_p12 = scmp.ne.s32.totalorder %s712_s30, %s550_s8  ;;  %s555_s11 = scalar_lea.hbm %s798_s0, 128 }
  0x12   : > { %p556_p2 = scmp.lt.u32.totalorder %s712_s30, %s798_s0  ;;  %p557_p3 = scmp.lt.u32.totalorder %s555_s11, %s550_s8 }
  0x13   : > { %p553_p0 = pnand %p552_p13, %p551_p12  ;;  %p559_p5 = scmp.lt.u32.totalorder %s550_s8, %s712_s30 }
  0x14   : > { %p558_p4 = por %p557_p3, %p556_p2 }
  0x15   : > { %p554_p1 = pneg %p553_p0 }
  0x16   : > { %p560_p6 = por %p559_p5, %p558_p4 }
  0x18   : > { %p561_p8 = pnand %p560_p6, %p554_p1 }
  0x1a   : > { %564 = shalt.err (!%p561_p8)
}
  0x1b   : > { %s565_s20 = scalar_lea.vmem %s720_s5, 64  ;;  %s632_s21 = smov [#allocation5]  }
  0x1c   : > { %p566_p12 = scmp.ne.s32.totalorder %s720_s5, %s565_s20  ;;  %s570_s22 = sshll.u32 %s632_s21, 4  ;;  %s571_s22 = int_to_ptr.vmem [resolvable:$false] %s570_s22 }
  0x1d   : > { %s572_s25 = scalar_lea.vmem %s571_s22, 128  ;;  %p573_p11 = scmp.lt.s32.totalorder %s720_s5, %s571_s22 }
  0x1e   : > { %p568_p0 = pnand %p566_p12, %p552_p13  ;;  %p574_p2 = scmp.lt.s32.totalorder %s572_s25, %s565_s20 }
  0x20   : > { %p569_p10 = pneg %p568_p0  ;;  %p575_p3 = por %p574_p2, %p573_p11 }
  0x22   : > { %p576_p4 = pnand %p575_p3, %p569_p10 }
  0x24   : > { %579 = shalt.err (!%p576_p4)
}
  0x25   : > { %495 = dma.hbm_to_vmem [thread:$0]  (!%p716_p9), %s712_s30, 64, %s720_s5, %s157_s7  }
  0x26   : > { %p805_p1 = scmp.lt.s32.totalorder %s630_s17, 3  ;;  %p806_p5 = scmp.ge.s32.totalorder %s630_s17, 1 }
  0x28   : > { %p200_p13 = pnand %p806_p5, %p805_p1 }
  0x29   : > { %s205_s26 = sand.u32 (!%p200_p13), 1, %s614_s13  }
  0x2a   : > { %203 = sbr.rel (%p200_p13) target bundleno = 362 (0x16a), region = 32  ;;  %s483_s27 = sshll.u32 (!%p200_p13), %s205_s26, 2 }
  0x2b   : > { %s206_s28 = scalar_lea.sflag (!%p200_p13), [#allocation6], %s205_s26  ;;  %s209_s29 = scalar_lea.vmem (!%p200_p13), [#allocation5], %s483_s27 }
  0x31   : > { %605 = dma.done.wait (%p699_p7), %s206_s28, 64  }
  0x32   : > { %607 = vsyncadd (%p699_p7), %s206_s28, 4294967232  ;;  %p249_p10 = scmp.lt.s32.totalorder %s622_s15, 1  ;;  %v287_v0 = vlaneseq  ;;  %vm274_vm0 = vcmask 3072   ;;  %v633_v1 = vmov 0.0   ;;  %v278_v8 = vld [vmem:[%s209_s29] sm:$0xf] }
  0x33   : > { %276 = vst.msk [vmem:[#allocation3] sm:$0xf] %vm274_vm0, %v633_v1  ;;  %275 = vst.msk [vmem:[#allocation2] sm:$0xf] %vm274_vm0, %v633_v1  ;;  %v279_v11 = vunpack.c.l.bf16 %v278_v8  ;;  %vm319_vm1 = vcmask 1043456   ;;  %s634_s18 = smov 1  }
  0x34   : > { %277 = vst.msk [vmem:[#allocation4] sm:$0xf] %vm274_vm0, %v633_v1  ;;  %s815_s15 = smov (!%p249_p10, %s622_s15), 1  ;;  %v288_v2 = vshrl.u32 %v287_v0, 7  ;;  %s635_s20 = smov 2   ;;  %vm360_vm2 = vcmask 11272  }
  0x35   : > { %s484_s30 = sshll.u32 %s815_s15, 1  ;;  %s486_s9 = sshll.u32 %s815_s15, 2  ;;  %vm367_vm3 = vcmask 19472  }
  0x36   : > { %s264_s5 = scalar_lea.vmem %s800_s2, %s484_s30  ;;  %v289_v5 = vsub.s32 0, %v288_v2  ;;  %v293_v6 = vsub.s32 4, %v288_v2  ;;  %s255_s8 = scalar_lea.vmem %s799_s1, %s484_s30 }
  0x37   : > { %v283_v3 = vld [vmem:[%s264_s5] sm:$0x3]  ;;  %s269_s12 = scalar_lea.vmem %s801_s3, %s486_s9 }
  0x38   : > { %v284_v4 = vunpack.c.0.s8 %v283_v3  ;;  %v280_v17 = vld [vmem:[%s255_s8] sm:$0x3] }
  0x39   : > { %v281_v18 = vunpack.c.0.s8 %v280_v17 }
  0x3a   : > { %v285_v7 = vcvt.s32.f32 %v284_v4  ;;  %v328_v36 = vld [vmem:[#allocation3] sm:$0xf]  ;;  %v314_v38 = vld [vmem:[#allocation2] sm:$0xf] }
  0x3b   : > { %v282_v19 = vcvt.s32.f32 %v281_v18  ;;  %v339_v40 = vld [vmem:[#allocation4] sm:$0xf] }
  0x3c   : > { %v290_v9 = vrot.slane %v285_v7, %v289_v5  ;;  %v294_v10 = vrot.slane %v285_v7, %v293_v6 }
  0x3d   : > { %v341_v23 = vcombine.high %v282_v19, %v282_v19  ;;  %v343_v27 = vsel %vm319_vm1, %v282_v19, 0.0 }
  0x3e   : > { %v300_v12 = vrot.slane %v290_v9, %v289_v5  ;;  %v304_v13 = vrot.slane %v294_v10, %v289_v5 }
  0x3f   : > { %v344_v29 = vsel %vm319_vm1, %v341_v23, 0.0 }
  0x40   : > { %v307_v14 = vcombine.low %v300_v12, %v304_v13  ;;  %v345_v34 = vadd.f32 %v344_v29, %v343_v27 }
  0x42   : > { %v309_v15 = vmul.f32 %v307_v14, %v279_v11 }
  0x44   : > { %v310_v16 = vmul.f32 0.5, %v309_v15 }
  0x46   : > { %548 = vtanh.f32 %v310_v16 }
  0x50   : > { %v549_v20 = vpop.eup %548 }
  0x51   : > { %v312_v21 = vmul.f32 0.5, %v549_v20 }
  0x53   : > { %v313_v22 = vadd.f32 0.5, %v312_v21 }
  0x55   : > { %v330_v24 = vcombine.high %v313_v22, %v313_v22  ;;  %v332_v25 = vsel %vm319_vm1, %v313_v22, 0.0  ;;  %v315_v26 = vmul.f32 %v313_v22, %v282_v19 }
  0x57   : > { %v333_v28 = vsel %vm319_vm1, %v330_v24, 0.0  ;;  %v317_v30 = vcombine.high %v315_v26, %v315_v26  ;;  %v320_v31 = vsel %vm319_vm1, %v315_v26, 0.0 }
  0x58   : > { %v334_v32 = vadd.f32 %v333_v28, %v332_v25 }
  0x59   : > { %v321_v33 = vsel %vm319_vm1, %v317_v30, 0.0 }
  0x5a   : > { %335 = vadd.xlane.f32.xlu0 %v334_v32  ;;  %v322_v35 = vadd.f32 %v321_v33, %v320_v31 }
  0x5c   : > { %323 = vadd.xlane.f32.xlu1 %v322_v35 }
  0x5e   : > { %346 = vadd.xlane.f32.xlu0 %v345_v34 }
  0xe7   : > { %v336_v37 = vpop.xlane.xlu0 %335 }
  0xe8   : > { %v337_v39 = vadd.f32 %v336_v37, %v328_v36 }
  0xe9   : > { %v324_v41 = vpop.xlane.xlu1 %323 }
  0xea   : > { %338 = vst.msk [vmem:[#allocation3] sm:$0xf] %vm274_vm0, %v337_v39  ;;  %v325_v42 = vadd.f32 %v324_v41, %v314_v38 }
  0xeb   : > { %v347_v43 = vpop.xlane.xlu0 %346 }
  0xec   : > { %v348_v44 = vadd.f32 %v347_v43, %v339_v40  ;;  %327 = vst.msk [vmem:[#allocation2] sm:$0xf] %vm274_vm0, %v325_v42 }
  0xee   : > { %349 = vst.msk [vmem:[#allocation4] sm:$0xf] %vm274_vm0, %v348_v44 }
  0xf1   : > { %v355_v45 = vld [vmem:[#allocation3] sm:$0xf] }
  0xf2   : > { %357 = vrot.lane.b32.xlu1 %v355_v45, %s634_s18 }
  0xf3   : > { %v353_v46 = vld [vmem:[#allocation2] sm:$0xf] }
  0xf4   : > { %354 = vst.msk [vmem:[%s269_s12] sm:$0xf] %vm274_vm0, %v353_v46 }
  0xf5   : > { %v362_v47 = vld [vmem:[#allocation4] sm:$0xf] }
  0xf6   : > { %364 = vrot.lane.b32.xlu0 %v362_v47, %s635_s20 }
 0x164   : > { %v358_v48 = vpop.permute.xlu1 %357 }
 0x165   : > { %361 = vst.msk [vmem:[%s269_s12] sm:$0xf] %vm360_vm2, %v358_v48 }
 0x168   : > { %v365_v49 = vpop.permute.xlu0 %364 }
 0x169   : > { %368 = vst.msk [vmem:[%s269_s12] sm:$0xf] %vm367_vm3, %v365_v49 }
 0x16a PF: > { %s16_s17 = sadd.s32 1, %s630_s17   ;;  %s807_s12 = smov %s614_s13 }
 0x16b   : > { %p13_p7 = scmp.ge.s32.totalorder %s16_s17, 4   ;;  %s808_s13 = smov %s618_s14 }
 0x16c   : > { %s809_s14 = smov %s705_s24  ;;  %s810_s15 = smov %s626_s16 }
 0x16d   : > { %s811_s16 = smov %s813_s19  ;;  %15 = sbr.rel (!%p13_p7) target bundleno = 4 (0x4), region = 86 }
 0x174   :  { %388 = vsyncpa [#allocation6], 1 }
 0x175   :  { %390 = vsyncpa [#allocation6 + $0x1], 1 }

</bundles_post_ra>
